<compile_context>
chip_gen: v6e
topology: v6e:2x2x1
jax: 0.10.0
libtpu: 0.0.40
codegen_flags: <defaults>
</compile_context>

<pallas_src>
import functools

import jax
import jax.numpy as jnp
from jax.experimental import pallas as pl
from jax.experimental.pallas import tpu as pltpu

GAMMA = 2.0
ALPHA = 0.25
NUM_CLASSES = 3
SIZE_AVERAGE = True

_LANE = 128
_SUBLANE = 8
_MAX_TILE_M = 32768   # lane-dim tile: (3, 32768) f32 ≈ 1 MiB per pipeline buffer
_MIN_TILE_M = 512


def _round_up(x, m):
    return (x + m - 1) // m * m


def _focal_loss_kernel(preds_ref, labels_ref, alpha_ref, out_ref, *, m_true, gamma):
    """One tile of `tm` samples; class axis on sublanes, samples on lanes.

    preds_ref  : (C, tm)  f32 logits
    labels_ref : (1, tm)  i32 class ids
    alpha_ref  : (C, 1)   f32 per-class weights
    out_ref    : (8, 128) f32; this tile's partial loss sum goes to [0, 0]
    """
    logits = preds_ref[...]                                       # (C, tm)
    labels = labels_ref[...]                                      # (1, tm)
    alpha = alpha_ref[...]                                        # (C, 1)
    C, tm = logits.shape

    # Numerically-stable log-softmax over the class (sublane) axis.
    m = jnp.max(logits, axis=0, keepdims=True)                    # (1, tm)
    shifted = logits - m                                          # (C, tm)
    denom = jnp.sum(jnp.exp(shifted), axis=0, keepdims=True)      # (1, tm)

    # Gather at the label row via a one-hot mask (no dynamic gather on TPU);
    # the same mask also gathers the per-class alpha weight.
    row = jax.lax.broadcasted_iota(jnp.int32, (C, tm), 0)
    onehot = row == labels                                        # (C, tm)

    shifted_t = jnp.sum(jnp.where(onehot, shifted, 0.0), axis=0, keepdims=True)
    logpt = shifted_t - jnp.log(denom)                            # log p[label]
    pt = jnp.exp(logpt)                                           # p[label] (EUP)
    alpha_t = jnp.sum(jnp.where(onehot, alpha, 0.0), axis=0, keepdims=True)

    om = 1.0 - pt
    if gamma == 2.0:
        focal = om * om                 # strength-reduced pow (gamma statically 2)
    elif gamma == 1.0:
        focal = om
    elif gamma == 0.0:
        focal = jnp.ones_like(om)
    else:
        focal = jnp.power(om, gamma)

    loss = -alpha_t * focal * logpt                               # (1, tm)

    # Mask padded samples of the (possibly remainder) tile.
    i = pl.program_id(0)
    col = jax.lax.broadcasted_iota(jnp.int32, (1, tm), 1)
    valid = (i * tm + col) < m_true
    tile_sum = jnp.sum(jnp.where(valid, loss, 0.0))

    # Place the partial sum at [0, 0] of an aligned (8, 128) output block.
    # (Iotas are grid-invariant; Mosaic hoists them out of the grid loop.)
    r = jax.lax.broadcasted_iota(jnp.int32, (_SUBLANE, _LANE), 0)
    c = jax.lax.broadcasted_iota(jnp.int32, (_SUBLANE, _LANE), 1)
    out_ref[...] = jnp.where((r == 0) & (c == 0), tile_sum, 0.0)


def focal_loss(preds, labels, alpha_vec, *, gamma=GAMMA,
               size_average=SIZE_AVERAGE, tile_m=None):
    """preds: [..., C] float logits; labels: [...] int class ids; alpha_vec: [C]."""
    C = preds.shape[-1]
    preds2d = preds.reshape(-1, C).astype(jnp.float32)
    labels1d = labels.reshape(-1).astype(jnp.int32)
    M = preds2d.shape[0]

    # Lane-dense tiling over samples: biggest tile that comfortably fits VMEM
    # (amortizes the per-grid-step overhead), clamped down for small inputs.
    if tile_m is None:
        tile_m = min(_MAX_TILE_M, _round_up(max(M, 1), _MIN_TILE_M))
    tm = max(_LANE, _round_up(tile_m, _LANE))
    M_pad = _round_up(M, tm)
    num_tiles = M_pad // tm
    pad = M_pad - M

    # Transpose once in the wrapper so the kernel sees a lane-dense sample axis;
    # the (M, 3) transpose is far cheaper than running the kernel class-on-lanes.
    preds_t = jnp.pad(preds2d.T, ((0, 0), (0, pad)))              # (C, M_pad)
    labels_t = jnp.pad(labels1d, (0, pad)).reshape(1, M_pad)      # (1, M_pad)
    alpha_col = jnp.asarray(alpha_vec, jnp.float32).reshape(C, 1)  # (C, 1)

    kernel = functools.partial(_focal_loss_kernel, m_true=M, gamma=float(gamma))

    partials = pl.pallas_call(
        kernel,
        out_shape=jax.ShapeDtypeStruct((num_tiles * _SUBLANE, _LANE), jnp.float32),
        grid_spec=pltpu.PrefetchScalarGridSpec(
            num_scalar_prefetch=0,
            grid=(num_tiles,),
            in_specs=[
                pl.BlockSpec((C, tm), lambda i: (0, i)),
                pl.BlockSpec((1, tm), lambda i: (0, i)),
                pl.BlockSpec((C, 1), lambda i: (0, 0)),
            ],
            out_specs=pl.BlockSpec((_SUBLANE, _LANE), lambda i: (i, 0)),
        ),
        compiler_params=pltpu.CompilerParams(
            dimension_semantics=("parallel",)),
    )(preds_t, labels_t, alpha_col)

    total = jnp.sum(partials)
    if size_average:
        return total / jnp.float32(M)
    return total


def _reference_focal_loss(preds, labels, alpha_vec, gamma=GAMMA,
                          size_average=SIZE_AVERAGE):
    C = preds.shape[-1]
    preds2d = preds.reshape(-1, C).astype(jnp.float32)
    labels1d = labels.reshape(-1).astype(jnp.int32)
    p = jax.nn.softmax(preds2d, axis=1)
    logp = jnp.log(p)
    idx = jnp.arange(preds2d.shape[0])
    pt = p[idx, labels1d]
    logpt = logp[idx, labels1d]
    at = jnp.asarray(alpha_vec, jnp.float32)[labels1d]
    loss = -at * (1.0 - pt) ** gamma * logpt
    return jnp.mean(loss) if size_average else jnp.sum(loss)


if __name__ == "__main__":
    key = jax.random.PRNGKey(0)
    k1, k2, k3, k4 = jax.random.split(key, 4)

    C = NUM_CLASSES
    # alpha = [alpha, 1-alpha, 1-alpha, ...]  (per module __init__ default)
    alpha_vec = jnp.concatenate(
        [jnp.array([ALPHA], jnp.float32),
         jnp.full((C - 1,), 1.0 - ALPHA, jnp.float32)]
    )

    # Case 1: classification-style [B, C] / [B] — single snug tile.
    B = 8
    preds_a = jax.random.normal(k1, (B, C), dtype=jnp.float32)
    labels_a = jax.random.randint(k2, (B,), 0, C, dtype=jnp.int32)
    out_a = jax.block_until_ready(focal_loss(preds_a, labels_a, alpha_vec))
    ref_a = jax.block_until_ready(_reference_focal_loss(preds_a, labels_a, alpha_vec))
    assert jnp.allclose(out_a, ref_a, rtol=1e-5, atol=1e-5), (out_a, ref_a)

    # Case 2: detection-style [B, N, C] / [B, N] — small tile forces a multi-tile
    # parallel grid + remainder masking.
    Bn, N = 2, 1300
    preds_b = jax.random.normal(k3, (Bn, N, C), dtype=jnp.float32)
    labels_b = jax.random.randint(k4, (Bn, N), 0, C, dtype=jnp.int32)
    out_b = jax.block_until_ready(
        focal_loss(preds_b, labels_b, alpha_vec, tile_m=512))
    ref_b = jax.block_until_ready(_reference_focal_loss(preds_b, labels_b, alpha_vec))
    assert jnp.allclose(out_b, ref_b, rtol=1e-5, atol=1e-5), (out_b, ref_b)

    print("KERNEL_OK")
</pallas_src>

<mosaic_0001>
module attributes {stable_mosaic.version = 11 : i64} {
  func.func @_focal_loss_kernel(%arg0: i32, %arg1: memref<3x512xf32, #tpu.memory_space<vmem>>, %arg2: memref<1x512xi32, #tpu.memory_space<vmem>>, %arg3: memref<3x1xf32, #tpu.memory_space<vmem>>, %arg4: memref<8x128xf32, #tpu.memory_space<vmem>>) attributes {dimension_semantics = [#tpu.dimension_semantics<parallel>], iteration_bounds = array<i64: 1>, scalar_prefetch = 0 : i64, scratch_operands = 0 : i64, tpu.core_type = #tpu.core_type<tc>, window_params = [{transform_indices = @transform_0, window_bounds = array<i64: 3, 512>}, {transform_indices = @transform_1, window_bounds = array<i64: 1, 512>}, {pipeline_mode = #tpu.pipeline_mode<synchronous>, transform_indices = @transform_2, window_bounds = array<i64: 3, 1>}, {transform_indices = @transform_3, window_bounds = array<i64: 8, 128>}]} {
    %c0 = arith.constant 0 : index
    %c0_0 = arith.constant 0 : index
    %0 = vector.load %arg1[%c0, %c0_0] : memref<3x512xf32, #tpu.memory_space<vmem>>, vector<3x512xf32>
    %c0_1 = arith.constant 0 : index
    %c0_2 = arith.constant 0 : index
    %1 = vector.load %arg2[%c0_1, %c0_2] : memref<1x512xi32, #tpu.memory_space<vmem>>, vector<1x512xi32>
    %c0_3 = arith.constant 0 : index
    %c0_4 = arith.constant 0 : index
    %2 = vector.load %arg3[%c0_3, %c0_4] : memref<3x1xf32, #tpu.memory_space<vmem>>, vector<3x1xf32>
    %cst = arith.constant dense<0xFF800000> : vector<512xf32>
    %3 = vector.multi_reduction <maximumf>, %0, %cst [0] : vector<3x512xf32> to vector<512xf32>
    %4 = vector.shape_cast %3 : vector<512xf32> to vector<1x512xf32>
    %5 = vector.broadcast %4 : vector<1x512xf32> to vector<3x512xf32>
    %6 = arith.subf %0, %5 : vector<3x512xf32>
    %7 = math.exp %6 : vector<3x512xf32>
    %cst_5 = arith.constant dense<0.000000e+00> : vector<512xf32>
    %8 = vector.multi_reduction <add>, %7, %cst_5 [0] : vector<3x512xf32> to vector<512xf32>
    %9 = vector.shape_cast %8 : vector<512xf32> to vector<1x512xf32>
    %10 = tpu.iota {dimensions = array<i32: 0>} : vector<3x512xi32>
    %11 = vector.broadcast %1 : vector<1x512xi32> to vector<3x512xi32>
    %12 = arith.cmpi eq, %10, %11 : vector<3x512xi32>
    %cst_6 = arith.constant 0.000000e+00 : f32
    %13 = vector.broadcast %cst_6 : f32 to vector<3x512xf32>
    %14 = arith.select %12, %6, %13 : vector<3x512xi1>, vector<3x512xf32>
    %cst_7 = arith.constant dense<0.000000e+00> : vector<512xf32>
    %15 = vector.multi_reduction <add>, %14, %cst_7 [0] : vector<3x512xf32> to vector<512xf32>
    %16 = vector.shape_cast %15 : vector<512xf32> to vector<1x512xf32>
    %17 = math.log %9 : vector<1x512xf32>
    %18 = arith.subf %16, %17 : vector<1x512xf32>
    %19 = math.exp %18 : vector<1x512xf32>
    %cst_8 = arith.constant 0.000000e+00 : f32
    %20 = vector.shape_cast %2 : vector<3x1xf32> to vector<3x1xf32>
    %21 = vector.broadcast %20 : vector<3x1xf32> to vector<3x512xf32>
    %22 = vector.broadcast %cst_8 : f32 to vector<3x512xf32>
    %23 = arith.select %12, %21, %22 : vector<3x512xi1>, vector<3x512xf32>
    %cst_9 = arith.constant dense<0.000000e+00> : vector<512xf32>
    %24 = vector.multi_reduction <add>, %23, %cst_9 [0] : vector<3x512xf32> to vector<512xf32>
    %25 = vector.shape_cast %24 : vector<512xf32> to vector<1x512xf32>
    %cst_10 = arith.constant 1.000000e+00 : f32
    %26 = vector.broadcast %cst_10 : f32 to vector<1x512xf32>
    %27 = arith.subf %26, %19 : vector<1x512xf32>
    %28 = arith.mulf %27, %27 : vector<1x512xf32>
    %cst_11 = arith.constant 0.000000e+00 : f32
    %29 = vector.broadcast %cst_11 : f32 to vector<1x512xf32>
    %30 = arith.subf %29, %25 : vector<1x512xf32>
    %31 = arith.mulf %30, %28 : vector<1x512xf32>
    %32 = arith.mulf %31, %18 : vector<1x512xf32>
    %33 = tpu.iota {dimensions = array<i32: 1>} : vector<1x512xi32>
    %c512_i32 = arith.constant 512 : i32
    %34 = arith.muli %arg0, %c512_i32 : i32
    %35 = vector.broadcast %34 : i32 to vector<1x512xi32>
    %36 = arith.addi %35, %33 : vector<1x512xi32>
    %c8_i32 = arith.constant 8 : i32
    %37 = vector.broadcast %c8_i32 : i32 to vector<1x512xi32>
    %38 = arith.cmpi slt, %36, %37 : vector<1x512xi32>
    %cst_12 = arith.constant 0.000000e+00 : f32
    %39 = vector.broadcast %cst_12 : f32 to vector<1x512xf32>
    %40 = arith.select %38, %32, %39 : vector<1x512xi1>, vector<1x512xf32>
    %41 = vector.shape_cast %40 : vector<1x512xf32> to vector<1x1x512xf32>
    %cst_13 = arith.constant dense<0.000000e+00> : vector<1xf32>
    %42 = vector.multi_reduction <add>, %41, %cst_13 [1, 2] : vector<1x1x512xf32> to vector<1xf32>
    %43 = vector.shape_cast %42 : vector<1xf32> to vector<1x1x1xf32>
    %44 = vector.extract %43[0, 0, 0] : f32 from vector<1x1x1xf32>
    %45 = tpu.iota {dimensions = array<i32: 0>} : vector<8x128xi32>
    %46 = tpu.iota {dimensions = array<i32: 1>} : vector<8x128xi32>
    %c0_i32 = arith.constant 0 : i32
    %47 = vector.broadcast %c0_i32 : i32 to vector<8x128xi32>
    %48 = arith.cmpi eq, %45, %47 : vector<8x128xi32>
    %c0_i32_14 = arith.constant 0 : i32
    %49 = vector.broadcast %c0_i32_14 : i32 to vector<8x128xi32>
    %50 = arith.cmpi eq, %46, %49 : vector<8x128xi32>
    %51 = arith.andi %48, %50 : vector<8x128xi1>
    %cst_15 = arith.constant 0.000000e+00 : f32
    %52 = vector.broadcast %44 : f32 to vector<8x128xf32>
    %53 = vector.broadcast %cst_15 : f32 to vector<8x128xf32>
    %54 = arith.select %51, %52, %53 : vector<8x128xi1>, vector<8x128xf32>
    %c0_16 = arith.constant 0 : index
    %c0_17 = arith.constant 0 : index
    %55 = vector.load %arg4[%c0_16, %c0_17] : memref<8x128xf32, #tpu.memory_space<vmem>>, vector<8x128xf32>
    tpu.vector_store %arg4[%c0_16, %c0_17], %54 {strides = array<i32>} : memref<8x128xf32, #tpu.memory_space<vmem>>, vector<8x128xf32>,
    return
  }
  func.func @transform_0(%arg0: i32) -> (i32, i32) {
    %c0_i32 = arith.constant 0 : i32
    %c0_i32_0 = arith.constant 0 : i32
    return %c0_i32, %arg0 : i32, i32
  }
  func.func @transform_1(%arg0: i32) -> (i32, i32) {
    %c0_i32 = arith.constant 0 : i32
    %c0_i32_0 = arith.constant 0 : i32
    return %c0_i32, %arg0 : i32, i32
  }
  func.func @transform_2(%arg0: i32) -> (i32, i32) {
    %c0_i32 = arith.constant 0 : i32
    %c0_i32_0 = arith.constant 0 : i32
    %c0_i32_1 = arith.constant 0 : i32
    return %c0_i32, %c0_i32_0 : i32, i32
  }
  func.func @transform_3(%arg0: i32) -> (i32, i32) {
    %c0_i32 = arith.constant 0 : i32
    %c0_i32_0 = arith.constant 0 : i32
    return %arg0, %c0_i32 : i32, i32
  }
}

</mosaic_0001>

<bundles_post_ra>
// kernel: tpu_custom_call.1
= control target key start
LH: loop header
LB: loop body
LE: loop exit
PB: predicated region body
PF: predicated region fallthrough
CT: control target
= control target key end

     0   :  { %8 = vsyncpa [#allocation3], 0  ;;  %s407_s0 = inlined_call_operand.hbm [shape: f32[3,512], index: 0, kind: input, shape index: {}]   ;;  %s408_s1 = inlined_call_operand.vmem [shape: s32[1,512], index: 1, kind: input, shape index: {}]   ;;  %s409_s2 = inlined_call_operand.vmem [shape: f32[3,1], index: 2, kind: input, shape index: {}]   ;;  %s410_s3 = inlined_call_operand.hbm [shape: f32[8,128], index: 3, kind: output, shape index: {}]  }
   0x1   :  { %9 = vsyncpa [#allocation4], 0  ;;  %s365_s12 = smov [#allocation2]  }
   0x2   :  { %s16_s13 = sshll.u32 %s365_s12, 4  ;;  %s17_s13 = int_to_ptr.vmem [resolvable:$true] %s16_s13 }
   0x3   :  { %s329_s14 = scalar_lea.vmem %s17_s13, 256  ;;  %p334_p1 = scmp.lt.s32.totalorder %s17_s13, %s17_s13 }
   0x4   :  { %p330_p0 = scmp.ne.s32.totalorder %s17_s13, %s329_s14  ;;  %p335_p2 = scmp.lt.s32.totalorder %s329_s14, %s329_s14 }
   0x6   :  { %p336_p3 = por %p335_p2, %p334_p1 }
   0x8   :  { %p337_p4 = pnand %p336_p3, %p330_p0 }
   0xa   :  { %340 = shalt.err (!%p337_p4)
}
   0xb   :  { %19 = dma.hbm_to_vmem [thread:$0]  %s407_s0, 256, %s17_s13, [#allocation3]  }
   0xc   :  { %361 = dma.done.wait [#allocation3], 256  }
   0xd   :  { %362 = vsyncadd [#allocation3], 4294967040  ;;  %v366_v0 = vmov 0   ;;  %v30_v1 = vld [vmem:[%s409_s2] sm:$0x7]  ;;  %vm37_vm0 = vcmask 1042432   ;;  %v114_v22 = vlaneseq }
   0xe   :  { %313 = vset.pattern.permute.xlu0 %v366_v0  ;;  %v27_v2 = vld [vmem:[#allocation2] sm:$0x77]  ;;  %vm270_vm3 = vcmask 1040384  }
   0xf   :  { %196 = vperm.xlu0 %313, %v30_v1   ;;  %v33_v3 = vcombine.high %v27_v2, %v27_v2  ;;  %v38_v4 = vsel %vm37_vm0, %v27_v2, -inf  ;;  %v115_v24 = vshrl.u32 %v114_v22, 7  ;;  %v29_v27 = vld [vmem:[%s408_s1] sm:$0xf]  ;;  %v252_v58 = vand.u32 127, %v114_v22  ;;  %s367_s1 = smov [#allocation5]  }
  0x10   :  { %v39_v6 = vrot.slane %v38_v4, 4  ;;  %s299_s19 = sshll.u32 %s367_s1, 4  ;;  %s300_s19 = int_to_ptr.vmem [resolvable:$true] %s299_s19 }
  0x11   :  { %v45_v5 = vsel %vm37_vm0, %v33_v3, -inf  ;;  %v118_v26 = vsub.s32 0, %v115_v24  ;;  %vm262_vm2 = vcmp.lt.s32.totalorder %v252_v58, 8  ;;  %vm287_vm4 = vcmp.eq.s32.totalorder %v115_v24, 0  ;;  %s341_s21 = scalar_lea.vmem %s300_s19, 128  ;;  %p346_p6 = scmp.lt.s32.totalorder %s300_s19, %s300_s19 }
  0x12   :  { %v46_v7 = vrot.slane %v45_v5, 4  ;;  %v40_v8 = vmax.f32 %v38_v4, %v39_v6  ;;  %vm288_vm5 = vcmp.eq.s32.totalorder %v252_v58, 0  ;;  %p342_p5 = scmp.ne.s32.totalorder %s300_s19, %s341_s21  ;;  %p347_p7 = scmp.lt.s32.totalorder %s341_s21, %s341_s21 }
  0x13   :  { %v119_v29 = vrot.slane %v29_v27, %v118_v26  ;;  %vm289_vm6 = vmand %vm287_vm4, %vm288_vm5 }
  0x14   :  { %v47_v9 = vmax.f32 %v45_v5, %v46_v7  ;;  %v41_v10 = vrot.slane %v40_v8, 2  ;;  %p348_p8 = por %p347_p7, %p346_p6 }
  0x15   :  { %vm132_vm1 = vcmp.eq.s32.totalorder %v115_v24, %v119_v29 }
  0x16   :  { %v48_v11 = vrot.slane %v47_v9, 2  ;;  %v42_v12 = vmax.f32 %v40_v8, %v41_v10  ;;  %p349_p9 = pnand %p348_p8, %p342_p5 }
  0x18   :  { %v49_v13 = vmax.f32 %v47_v9, %v48_v11  ;;  %v43_v14 = vrot.slane %v42_v12, 1 }
  0x1a   :  { %v50_v15 = vrot.slane %v49_v13, 1  ;;  %v44_v16 = vmax.f32 %v42_v12, %v43_v14 }
  0x1c   :  { %v51_v17 = vmax.f32 %v49_v13, %v50_v15 }
  0x1e   :  { %v70_v18 = vcombine.low %v44_v16, %v51_v17 }
  0x20   :  { %v74_v19 = vsub.f32 %v27_v2, %v70_v18 }
  0x22   :  { %v76_v20 = vmul.f32 1.442695, %v74_v19  ;;  %v142_v32 = vsel %vm132_vm1, %v74_v19, 0.0 }
  0x23   :  { %v146_v34 = vsel %vm37_vm0, %v142_v32, 0.0 }
  0x24   :  { %315 = vpow2.f32 %v76_v20  ;;  %v147_v35 = vrot.slane %v146_v34, 4 }
  0x26   :  { %v148_v37 = vadd.f32 %v147_v35, %v146_v34 }
  0x28   :  { %v149_v38 = vrot.slane %v148_v37, 2 }
  0x2a   :  { %v150_v39 = vadd.f32 %v149_v38, %v148_v37 }
  0x2c   :  { %v151_v40 = vrot.slane %v150_v39, 1 }
  0x2e   :  { %v152_v42 = vadd.f32 %v151_v40, %v150_v39 }
  0x31   :  { %v316_v21 = vpop.eup %315 }
  0x32   :  { %v86_v23 = vsel %vm37_vm0, %v316_v21, 0.0 }
  0x33   :  { %v87_v25 = vrot.slane %v86_v23, 4 }
  0x35   :  { %v88_v28 = vadd.f32 %v87_v25, %v86_v23 }
  0x37   :  { %v89_v30 = vrot.slane %v88_v28, 2 }
  0x39   :  { %v90_v31 = vadd.f32 %v89_v30, %v88_v28 }
  0x3b   :  { %v91_v33 = vrot.slane %v90_v31, 1 }
  0x3d   :  { %v92_v36 = vadd.f32 %v91_v33, %v90_v31 }
  0x3f   :  { %317 = vlog2.f32 %v92_v36 }
  0x4c   :  { %v318_v41 = vpop.eup %317 }
  0x4d   :  { %v175_v43 = vmul.f32 0.6931472, %v318_v41 }
  0x4f   :  { %v182_v44 = vsub.f32 %v152_v42, %v175_v43 }
  0x51   :  { %v186_v45 = vmul.f32 1.442695, %v182_v44 }
  0x53   :  { %319 = vpow2.f32 %v186_v45 }
  0x60   :  { %v320_v51 = vpop.eup %319 }
  0x61   :  { %v231_v54 = vsub.f32 1.0, %v320_v51 }
  0x63   :  { %v235_v57 = vmul.f32 %v231_v54, %v231_v54 }
  0x8a   :  { %v197_v46 = vpop.permute.xlu0 %196 }
  0x8b   :  { %v199_v47 = vsel %vm132_vm1, %v197_v46, 0.0 }
  0x8c   :  { %v203_v48 = vsel %vm37_vm0, %v199_v47, 0.0 }
  0x8d   :  { %v204_v49 = vrot.slane %v203_v48, 4 }
  0x8f   :  { %v205_v50 = vadd.f32 %v204_v49, %v203_v48 }
  0x91   :  { %v206_v52 = vrot.slane %v205_v50, 2 }
  0x93   :  { %v207_v53 = vadd.f32 %v206_v52, %v205_v50 }
  0x95   :  { %v208_v55 = vrot.slane %v207_v53, 1 }
  0x97   :  { %v209_v56 = vadd.f32 %v208_v55, %v207_v53 }
  0x99   :  { %v239_v59 = vsub.f32 0.0, %v209_v56 }
  0x9b   :  { %v243_v60 = vmul.f32 %v239_v59, %v235_v57 }
  0x9d   :  { %v247_v61 = vmul.f32 %v243_v60, %v182_v44 }
  0x9f   :  { %v266_v62 = vsel %vm262_vm2, %v247_v61, 0.0 }
  0xa0   :  { %v271_v63 = vsel %vm270_vm3, %v266_v62, 0.0 }
  0xa1   :  { %278 = vadd.xlane.f32.xlu0 %v271_v63 }
 0x12a   :  { %v279_v0 = vpop.xlane.xlu0 %278 }
 0x12b   :  { %v280_v1 = vrot.slane %v279_v0, 4 }
 0x12d   :  { %v281_v2 = vadd.f32 %v280_v1, %v279_v0 }
 0x12f   :  { %v282_v3 = vrot.slane %v281_v2, 2 }
 0x131   :  { %v283_v4 = vadd.f32 %v282_v3, %v281_v2 }
 0x133   :  { %v284_v5 = vrot.slane %v283_v4, 1 }
 0x135   :  { %v285_v6 = vadd.f32 %v284_v5, %v283_v4 }
 0x137   :  { %308 = vpush %v285_v6 }
 0x168   :  { %s309_s20 = spop %308 }
 0x169   :  { %v290_v7 = vstv %s309_s20 }
 0x16a   :  { %v291_v8 = vsel %vm289_vm6, %v290_v7, 0.0 }
 0x16b   :  { %292 = vst [vmem:[#allocation5] sm:$0xff] %v291_v8 }
 0x16c   :  { %352 = shalt.err (!%p349_p9)
}
 0x16d   :  { %302 = dma.vmem_to_hbm [thread:$0]  %s300_s19, 128, %s410_s3, [#allocation4]  }
 0x16e   :  { %363 = dma.done.wait [#allocation4], 128  }
 0x16f   :  { %364 = vsyncadd [#allocation4], 4294967168 }
 0x170   :  { %306 = vsyncpa [#allocation3], 1 }
 0x171   :  { %307 = vsyncpa [#allocation4], 1 }

</bundles_post_ra>
